<compile_context>
chip_gen: v7x
topology: tpu7x:2x2x1
jax: 0.10.0
libtpu: 0.0.40
codegen_flags: <defaults>
</compile_context>

<pallas_src>
import math

import jax
import jax.numpy as jnp
from jax import lax
from jax.experimental import pallas as pl
from jax.experimental.pallas import tpu as pltpu


# --------------------- per-batch encoder kernel (grid=(B,)) ---------------------
def _encoder_kernel(emb_ref,    # [1, S, H]  bf16 token embeddings of batch b
                    wq_ref,     # [H, H]     bf16 (1/sqrt(H) folded in)
                    wk_ref,     # [H, H]     bf16
                    wv_ref,     # [H, H]     bf16
                    wpd_ref,    # [H, D]     bf16 doc pooled projection
                    wovpd_ref,  # [H, D]     bf16 wo @ wp_doc fold
                    nodes_ref,  # [1, N, F]  bf16 graph node features of batch b
                    adj_ref,    # [1, N, N]  bf16 adjacency of batch b (self-loops)
                    wg_ref,     # [F, Hg]    bf16 graph message weight
                    wpg_ref,    # [Hg, D]    bf16 graph pooled projection
                    doc_out_ref,    # [1, 1, D] f32
                    graph_out_ref,  # [1, 1, D] f32
                    ):
    f32 = jnp.float32
    bf16 = jnp.bfloat16

    # ---------------- doc encoder (single-layer RoBERTa-equiv) ----------------
    x = emb_ref[0]                                                    # [S, H] bf16
    q = jnp.dot(x, wq_ref[...], preferred_element_type=f32)          # scale folded
    k = jnp.dot(x, wk_ref[...], preferred_element_type=f32)
    v = jnp.dot(x, wv_ref[...], preferred_element_type=f32)

    scores = lax.dot_general(q.astype(bf16), k.astype(bf16),
                             (((1,), (1,)), ((), ())),
                             preferred_element_type=f32)              # [S, S]
    m = jnp.max(scores, axis=-1, keepdims=True)
    p = jnp.exp(scores - m)
    attn = p * pl.reciprocal(jnp.sum(p, axis=-1, keepdims=True), approx=True)

    # pool-before-project (exact; pooling is linear):
    #   mean_S(x + (attn @ v) @ wo) @ wpd
    #     = mean_S(x) @ wpd + (mean_rows(attn) @ v) @ (wo @ wpd)
    pool_attn = jnp.mean(attn, axis=0, keepdims=True)                 # [1, S] f32
    ctx = jnp.dot(pool_attn.astype(bf16), v.astype(bf16),
                  preferred_element_type=f32)                         # [1, H]
    pooled_x = jnp.mean(x.astype(f32), axis=0, keepdims=True)         # [1, H]
    doc_feat = (jnp.dot(pooled_x.astype(bf16), wpd_ref[...],
                        preferred_element_type=f32)
                + jnp.dot(ctx.astype(bf16), wovpd_ref[...],
                          preferred_element_type=f32))                # [1, D]
    doc_out_ref[...] = doc_feat[None]                                 # [1, 1, D]

    # ---------------- graph encoder (single-layer UniMP-equiv) ----------------
    xg = nodes_ref[0]                                                 # [N, F] bf16
    adj = adj_ref[0].astype(f32)                                      # [N, N]
    deg = jnp.sum(adj, axis=-1, keepdims=True)                        # >= 1 (self-loops)
    adj_n = (adj * pl.reciprocal(deg, approx=True)).astype(bf16)      # row-normalized
    xw = jnp.dot(xg, wg_ref[...], preferred_element_type=f32)         # [N, Hg]
    hg = jnp.dot(adj_n, xw.astype(bf16), preferred_element_type=f32)  # [N, Hg]
    hg = jnp.maximum(hg, 0.0)                                         # ReLU
    g_pooled = jnp.mean(hg, axis=0, keepdims=True)                    # [1, Hg]
    graph_feat = jnp.dot(g_pooled.astype(bf16), wpg_ref[...],
                         preferred_element_type=f32)                  # [1, D]
    graph_out_ref[...] = graph_feat[None]                             # [1, 1, D]


# ---------------------- SimLoss kernel (CLIP symmetric, tiny) -------------------
def _sim_loss_kernel(ls_ref,   # [1, 1] f32 logit_scale (SMEM)
                     d_ref,    # [B, D] f32 doc features (VMEM)
                     g_ref,    # [B, D] f32 graph features (VMEM)
                     out_ref,  # [1, 1] f32 scalar loss (SMEM)
                     ):
    d = d_ref[...]
    g = g_ref[...]
    ls = ls_ref[0, 0]
    bsz = d.shape[0]

    dn = d * lax.rsqrt(jnp.sum(d * d, axis=-1, keepdims=True) + 1e-12)
    gn = g * lax.rsqrt(jnp.sum(g * g, axis=-1, keepdims=True) + 1e-12)

    # diagonal logits directly (no [B,B] iota mask / masked select)
    diag = jnp.sum(dn * gn, axis=-1, keepdims=True) * ls              # [B, 1]

    def _lse(a, b):
        # row-softmax LSE; both directions computed lane-major via a @ b.T
        s = lax.dot_general(a, b, (((1,), (1,)), ((), ())),
                            preferred_element_type=jnp.float32) * ls  # [B, B]
        mx = jnp.max(s, axis=-1, keepdims=True)
        return mx + jnp.log(jnp.sum(jnp.exp(s - mx), axis=-1, keepdims=True))

    loss_dg = jnp.sum(_lse(dn, gn) - diag) / bsz    # doc -> graph
    loss_gd = jnp.sum(_lse(gn, dn) - diag) / bsz    # graph -> doc
    out_ref[0, 0] = 0.5 * (loss_dg + loss_gd)


# ----------------------------------- CLR forward --------------------------------
def clr_forward(params, prompt_tokens, node_feats, adjacency,
                logit_scale=1.0 / 0.07):
    B, S = prompt_tokens.shape
    H = params["emb_table"].shape[1]
    _, N, F = node_feats.shape
    HG = params["wg"].shape[1]
    D = params["wp_doc"].shape[1]
    bf16 = jnp.bfloat16

    # Glue / weight folds in plain JAX (layout plumbing outside the kernels).
    # TODO(synk): the token-embedding gather could move in-kernel via
    # PrefetchScalarGridSpec(num_scalar_prefetch=1) + Element-indexed BlockSpec
    # at realistic S to avoid materializing [B,S,H] in HBM.
    emb = jnp.take(params["emb_table"], prompt_tokens, axis=0).astype(bf16)  # [B,S,H]
    nodes = node_feats.astype(bf16)                                          # [B,N,F]
    adj = adjacency.astype(bf16)                                             # [B,N,N]

    wq = (params["wq"] * (1.0 / math.sqrt(H))).astype(bf16)   # attention scale fold
    wk = params["wk"].astype(bf16)
    wv = params["wv"].astype(bf16)
    wpd = params["wp_doc"].astype(bf16)
    wovpd = jnp.dot(params["wo"], params["wp_doc"]).astype(bf16)   # wo @ wpd fold
    wg = params["wg"].astype(bf16)
    wpg = params["wp_graph"].astype(bf16)

    flops = B * (3 * 2 * S * H * H          # q/k/v projections
                 + 2 * S * S * H            # q @ k^T
                 + 2 * S * H                # pooled_attn @ v
                 + 2 * 2 * H * D            # doc projections
                 + 2 * N * F * HG           # node features @ wg
                 + 2 * N * N * HG           # adjacency message passing
                 + 2 * HG * D)              # graph projection
    bytes_accessed = 2 * (emb.size + nodes.size + adj.size + wq.size + wk.size
                          + wv.size + wpd.size + wovpd.size + wg.size + wpg.size) \
        + 2 * B * D * 4

    doc_feats, graph_feats = pl.pallas_call(
        _encoder_kernel,
        out_shape=(jax.ShapeDtypeStruct((B, 1, D), jnp.float32),
                   jax.ShapeDtypeStruct((B, 1, D), jnp.float32)),
        grid_spec=pltpu.PrefetchScalarGridSpec(
            num_scalar_prefetch=0,
            grid=(B,),
            in_specs=[
                pl.BlockSpec((1, S, H), lambda b: (b, 0, 0)),    # emb
                pl.BlockSpec((H, H), lambda b: (0, 0)),          # wq
                pl.BlockSpec((H, H), lambda b: (0, 0)),          # wk
                pl.BlockSpec((H, H), lambda b: (0, 0)),          # wv
                pl.BlockSpec((H, D), lambda b: (0, 0)),          # wpd
                pl.BlockSpec((H, D), lambda b: (0, 0)),          # wo @ wpd
                pl.BlockSpec((1, N, F), lambda b: (b, 0, 0)),    # nodes
                pl.BlockSpec((1, N, N), lambda b: (b, 0, 0)),    # adjacency
                pl.BlockSpec((F, HG), lambda b: (0, 0)),         # wg
                pl.BlockSpec((HG, D), lambda b: (0, 0)),         # wpg
            ],
            out_specs=(pl.BlockSpec((1, 1, D), lambda b: (b, 0, 0)),
                       pl.BlockSpec((1, 1, D), lambda b: (b, 0, 0))),
        ),
        compiler_params=pltpu.CompilerParams(
            dimension_semantics=("parallel",)),
        cost_estimate=pl.CostEstimate(flops=int(flops),
                                      transcendentals=int(B * S * S),
                                      bytes_accessed=int(bytes_accessed)),
    )(emb, wq, wk, wv, wpd, wovpd, nodes, adj, wg, wpg)

    # TODO(synk): logit_scale is a learned & clamped parameter in the reference;
    # here it is a runtime SMEM scalar (unclamped).
    ls = jnp.full((1, 1), logit_scale, jnp.float32)
    loss = pl.pallas_call(
        _sim_loss_kernel,
        out_shape=jax.ShapeDtypeStruct((1, 1), jnp.float32),
        in_specs=[pl.BlockSpec(memory_space=pltpu.MemorySpace.SMEM),
                  pl.BlockSpec(memory_space=pltpu.MemorySpace.VMEM),
                  pl.BlockSpec(memory_space=pltpu.MemorySpace.VMEM)],
        out_specs=pl.BlockSpec(memory_space=pltpu.MemorySpace.SMEM),
    )(ls, doc_feats.reshape(B, D), graph_feats.reshape(B, D))
    return loss


# --------------------------------------- main ------------------------------------
if __name__ == "__main__":
    B, S, V, H = 2, 8, 64, 32      # batch, seq len, vocab, doc hidden
    N, F, HG, D = 8, 16, 32, 32    # graph nodes, node feat, graph hidden, out_channels

    key = jax.random.PRNGKey(0)
    keys = jax.random.split(key, 12)

    params = {
        "emb_table": 0.02 * jax.random.normal(keys[0], (V, H), jnp.float32),
        "wq": 0.02 * jax.random.normal(keys[1], (H, H), jnp.float32),
        "wk": 0.02 * jax.random.normal(keys[2], (H, H), jnp.float32),
        "wv": 0.02 * jax.random.normal(keys[3], (H, H), jnp.float32),
        "wo": 0.02 * jax.random.normal(keys[4], (H, H), jnp.float32),
        "wp_doc": 0.02 * jax.random.normal(keys[5], (H, D), jnp.float32),
        "wg": 0.02 * jax.random.normal(keys[6], (F, HG), jnp.float32),
        "wp_graph": 0.02 * jax.random.normal(keys[7], (HG, D), jnp.float32),
    }

    prompt_tokens = jax.random.randint(keys[8], (B, S), 0, V)
    node_feats = jax.random.normal(keys[9], (B, N, F), jnp.float32)

    # symmetric random adjacency with self-loops
    raw = jax.random.bernoulli(keys[10], 0.4, (B, N, N)).astype(jnp.float32)
    adjacency = jnp.clip(raw + jnp.transpose(raw, (0, 2, 1)), 0.0, 1.0)
    adjacency = jnp.maximum(
        adjacency, jnp.broadcast_to(jnp.eye(N, dtype=jnp.float32), (B, N, N))
    )

    loss = clr_forward(params, prompt_tokens, node_feats, adjacency)
    loss = jax.block_until_ready(loss)
    assert loss.shape == (1, 1) and jnp.isfinite(loss).all()
    print("KERNEL_OK")
</pallas_src>

<mosaic_0001>
module attributes {stable_mosaic.version = 11 : i64} {
  func.func @_encoder_kernel(%arg0: i32, %arg1: memref<1x8x32xbf16, #tpu.memory_space<vmem>>, %arg2: memref<32x32xbf16, #tpu.memory_space<vmem>>, %arg3: memref<32x32xbf16, #tpu.memory_space<vmem>>, %arg4: memref<32x32xbf16, #tpu.memory_space<vmem>>, %arg5: memref<32x32xbf16, #tpu.memory_space<vmem>>, %arg6: memref<32x32xbf16, #tpu.memory_space<vmem>>, %arg7: memref<1x8x16xbf16, #tpu.memory_space<vmem>>, %arg8: memref<1x8x8xbf16, #tpu.memory_space<vmem>>, %arg9: memref<16x32xbf16, #tpu.memory_space<vmem>>, %arg10: memref<32x32xbf16, #tpu.memory_space<vmem>>, %arg11: memref<1x1x32xf32, #tpu.memory_space<vmem>>, %arg12: memref<1x1x32xf32, #tpu.memory_space<vmem>>) attributes {dimension_semantics = [#tpu.dimension_semantics<parallel>], iteration_bounds = array<i64: 2>, scalar_prefetch = 0 : i64, scratch_operands = 0 : i64, tpu.core_type = #tpu.core_type<tc>, window_params = [{transform_indices = @transform_0, window_bounds = array<i64: 1, 8, 32>}, {pipeline_mode = #tpu.pipeline_mode<synchronous>, transform_indices = @transform_1, window_bounds = array<i64: 32, 32>}, {pipeline_mode = #tpu.pipeline_mode<synchronous>, transform_indices = @transform_2, window_bounds = array<i64: 32, 32>}, {pipeline_mode = #tpu.pipeline_mode<synchronous>, transform_indices = @transform_3, window_bounds = array<i64: 32, 32>}, {pipeline_mode = #tpu.pipeline_mode<synchronous>, transform_indices = @transform_4, window_bounds = array<i64: 32, 32>}, {pipeline_mode = #tpu.pipeline_mode<synchronous>, transform_indices = @transform_5, window_bounds = array<i64: 32, 32>}, {transform_indices = @transform_6, window_bounds = array<i64: 1, 8, 16>}, {transform_indices = @transform_7, window_bounds = array<i64: 1, 8, 8>}, {pipeline_mode = #tpu.pipeline_mode<synchronous>, transform_indices = @transform_8, window_bounds = array<i64: 16, 32>}, {pipeline_mode = #tpu.pipeline_mode<synchronous>, transform_indices = @transform_9, window_bounds = array<i64: 32, 32>}, {transform_indices = @transform_10, window_bounds = array<i64: 1, 1, 32>}, {transform_indices = @transform_11, window_bounds = array<i64: 1, 1, 32>}]} {
    %c0 = arith.constant 0 : index
    %c0_0 = arith.constant 0 : index
    %c0_1 = arith.constant 0 : index
    %0 = vector.load %arg1[%c0, %c0_0, %c0_1] : memref<1x8x32xbf16, #tpu.memory_space<vmem>>, vector<1x8x32xbf16>
    %1 = vector.shape_cast %0 : vector<1x8x32xbf16> to vector<8x32xbf16>
    %c0_2 = arith.constant 0 : index
    %c0_3 = arith.constant 0 : index
    %2 = vector.load %arg2[%c0_2, %c0_3] : memref<32x32xbf16, #tpu.memory_space<vmem>>, vector<32x32xbf16>
    %cst = arith.constant dense<0.000000e+00> : vector<8x32xf32>
    %3 = tpu.matmul %1, %2, %cst {dimension_numbers = #tpu.dot_dimension_numbers<[1], [0], [0], [1], [0, 0, 1, 1], [], []>} : vector<8x32xbf16>, vector<32x32xbf16>, vector<8x32xf32> -> vector<8x32xf32>
    %c0_4 = arith.constant 0 : index
    %c0_5 = arith.constant 0 : index
    %4 = vector.load %arg3[%c0_4, %c0_5] : memref<32x32xbf16, #tpu.memory_space<vmem>>, vector<32x32xbf16>
    %cst_6 = arith.constant dense<0.000000e+00> : vector<8x32xf32>
    %5 = tpu.matmul %1, %4, %cst_6 {dimension_numbers = #tpu.dot_dimension_numbers<[1], [0], [0], [1], [0, 0, 1, 1], [], []>} : vector<8x32xbf16>, vector<32x32xbf16>, vector<8x32xf32> -> vector<8x32xf32>
    %c0_7 = arith.constant 0 : index
    %c0_8 = arith.constant 0 : index
    %6 = vector.load %arg4[%c0_7, %c0_8] : memref<32x32xbf16, #tpu.memory_space<vmem>>, vector<32x32xbf16>
    %cst_9 = arith.constant dense<0.000000e+00> : vector<8x32xf32>
    %7 = tpu.matmul %1, %6, %cst_9 {dimension_numbers = #tpu.dot_dimension_numbers<[1], [0], [0], [1], [0, 0, 1, 1], [], []>} : vector<8x32xbf16>, vector<32x32xbf16>, vector<8x32xf32> -> vector<8x32xf32>
    %8 = arith.truncf %3 : vector<8x32xf32> to vector<8x32xbf16>
    %9 = arith.truncf %5 : vector<8x32xf32> to vector<8x32xbf16>
    %cst_10 = arith.constant dense<0.000000e+00> : vector<8x8xf32>
    %10 = tpu.matmul %8, %9, %cst_10 {dimension_numbers = #tpu.dot_dimension_numbers<[1], [1], [0], [0], [0, 0, 1, 0], [], []>} : vector<8x32xbf16>, vector<8x32xbf16>, vector<8x8xf32> -> vector<8x8xf32>
    %cst_11 = arith.constant dense<0xFF800000> : vector<8xf32>
    %11 = vector.multi_reduction <maximumf>, %10, %cst_11 [1] : vector<8x8xf32> to vector<8xf32>
    %12 = vector.shape_cast %11 : vector<8xf32> to vector<8x1xf32>
    %13 = vector.broadcast %12 : vector<8x1xf32> to vector<8x8xf32>
    %14 = arith.subf %10, %13 : vector<8x8xf32>
    %15 = math.exp %14 : vector<8x8xf32>
    %cst_12 = arith.constant dense<0.000000e+00> : vector<8xf32>
    %16 = vector.multi_reduction <add>, %15, %cst_12 [1] : vector<8x8xf32> to vector<8xf32>
    %17 = vector.shape_cast %16 : vector<8xf32> to vector<8x1xf32>
    %18 = tpu.reciprocal %17 {approx = true} : vector<8x1xf32> -> vector<8x1xf32>
    %19 = vector.broadcast %18 : vector<8x1xf32> to vector<8x8xf32>
    %20 = arith.mulf %15, %19 : vector<8x8xf32>
    %cst_13 = arith.constant dense<0.000000e+00> : vector<8xf32>
    %21 = vector.multi_reduction <add>, %20, %cst_13 [0] : vector<8x8xf32> to vector<8xf32>
    %22 = vector.shape_cast %21 : vector<8xf32> to vector<1x8xf32>
    %cst_14 = arith.constant 8.000000e+00 : f32
    %23 = vector.broadcast %cst_14 : f32 to vector<1x8xf32>
    %24 = arith.divf %22, %23 : vector<1x8xf32>
    %25 = arith.truncf %24 : vector<1x8xf32> to vector<1x8xbf16>
    %26 = arith.truncf %7 : vector<8x32xf32> to vector<8x32xbf16>
    %cst_15 = arith.constant dense<0.000000e+00> : vector<1x32xf32>
    %27 = tpu.matmul %25, %26, %cst_15 {dimension_numbers = #tpu.dot_dimension_numbers<[1], [0], [0], [1], [0, 0, 1, 1], [], []>} : vector<1x8xbf16>, vector<8x32xbf16>, vector<1x32xf32> -> vector<1x32xf32>
    %28 = arith.extf %1 : vector<8x32xbf16> to vector<8x32xf32>
    %cst_16 = arith.constant dense<0.000000e+00> : vector<32xf32>
    %29 = vector.multi_reduction <add>, %28, %cst_16 [0] : vector<8x32xf32> to vector<32xf32>
    %30 = vector.shape_cast %29 : vector<32xf32> to vector<1x32xf32>
    %cst_17 = arith.constant 8.000000e+00 : f32
    %31 = vector.broadcast %cst_17 : f32 to vector<1x32xf32>
    %32 = arith.divf %30, %31 : vector<1x32xf32>
    %33 = arith.truncf %32 : vector<1x32xf32> to vector<1x32xbf16>
    %c0_18 = arith.constant 0 : index
    %c0_19 = arith.constant 0 : index
    %34 = vector.load %arg5[%c0_18, %c0_19] : memref<32x32xbf16, #tpu.memory_space<vmem>>, vector<32x32xbf16>
    %cst_20 = arith.constant dense<0.000000e+00> : vector<1x32xf32>
    %35 = tpu.matmul %33, %34, %cst_20 {dimension_numbers = #tpu.dot_dimension_numbers<[1], [0], [0], [1], [0, 0, 1, 1], [], []>} : vector<1x32xbf16>, vector<32x32xbf16>, vector<1x32xf32> -> vector<1x32xf32>
    %36 = arith.truncf %27 : vector<1x32xf32> to vector<1x32xbf16>
    %c0_21 = arith.constant 0 : index
    %c0_22 = arith.constant 0 : index
    %37 = vector.load %arg6[%c0_21, %c0_22] : memref<32x32xbf16, #tpu.memory_space<vmem>>, vector<32x32xbf16>
    %cst_23 = arith.constant dense<0.000000e+00> : vector<1x32xf32>
    %38 = tpu.matmul %36, %37, %cst_23 {dimension_numbers = #tpu.dot_dimension_numbers<[1], [0], [0], [1], [0, 0, 1, 1], [], []>} : vector<1x32xbf16>, vector<32x32xbf16>, vector<1x32xf32> -> vector<1x32xf32>
    %39 = arith.addf %35, %38 : vector<1x32xf32>
    %40 = vector.shape_cast %39 : vector<1x32xf32> to vector<1x1x32xf32>
    %c0_24 = arith.constant 0 : index
    %c0_25 = arith.constant 0 : index
    %c0_26 = arith.constant 0 : index
    %41 = vector.load %arg11[%c0_24, %c0_25, %c0_26] : memref<1x1x32xf32, #tpu.memory_space<vmem>>, vector<1x1x32xf32>
    tpu.vector_store %arg11[%c0_24, %c0_25, %c0_26], %40 {strides = array<i32>} : memref<1x1x32xf32, #tpu.memory_space<vmem>>, vector<1x1x32xf32>,
    %c0_27 = arith.constant 0 : index
    %c0_28 = arith.constant 0 : index
    %c0_29 = arith.constant 0 : index
    %42 = vector.load %arg7[%c0_27, %c0_28, %c0_29] : memref<1x8x16xbf16, #tpu.memory_space<vmem>>, vector<1x8x16xbf16>
    %43 = vector.shape_cast %42 : vector<1x8x16xbf16> to vector<8x16xbf16>
    %c0_30 = arith.constant 0 : index
    %c0_31 = arith.constant 0 : index
    %c0_32 = arith.constant 0 : index
    %44 = vector.load %arg8[%c0_30, %c0_31, %c0_32] : memref<1x8x8xbf16, #tpu.memory_space<vmem>>, vector<1x8x8xbf16>
    %45 = vector.shape_cast %44 : vector<1x8x8xbf16> to vector<8x8xbf16>
    %46 = arith.extf %45 : vector<8x8xbf16> to vector<8x8xf32>
    %cst_33 = arith.constant dense<0.000000e+00> : vector<8xf32>
    %47 = vector.multi_reduction <add>, %46, %cst_33 [1] : vector<8x8xf32> to vector<8xf32>
    %48 = vector.shape_cast %47 : vector<8xf32> to vector<8x1xf32>
    %49 = tpu.reciprocal %48 {approx = true} : vector<8x1xf32> -> vector<8x1xf32>
    %50 = vector.broadcast %49 : vector<8x1xf32> to vector<8x8xf32>
    %51 = arith.mulf %46, %50 : vector<8x8xf32>
    %52 = arith.truncf %51 : vector<8x8xf32> to vector<8x8xbf16>
    %c0_34 = arith.constant 0 : index
    %c0_35 = arith.constant 0 : index
    %53 = vector.load %arg9[%c0_34, %c0_35] : memref<16x32xbf16, #tpu.memory_space<vmem>>, vector<16x32xbf16>
    %cst_36 = arith.constant dense<0.000000e+00> : vector<8x32xf32>
    %54 = tpu.matmul %43, %53, %cst_36 {dimension_numbers = #tpu.dot_dimension_numbers<[1], [0], [0], [1], [0, 0, 1, 1], [], []>} : vector<8x16xbf16>, vector<16x32xbf16>, vector<8x32xf32> -> vector<8x32xf32>
    %55 = arith.truncf %54 : vector<8x32xf32> to vector<8x32xbf16>
    %cst_37 = arith.constant dense<0.000000e+00> : vector<8x32xf32>
    %56 = tpu.matmul %52, %55, %cst_37 {dimension_numbers = #tpu.dot_dimension_numbers<[1], [0], [0], [1], [0, 0, 1, 1], [], []>} : vector<8x8xbf16>, vector<8x32xbf16>, vector<8x32xf32> -> vector<8x32xf32>
    %cst_38 = arith.constant 0.000000e+00 : f32
    %57 = vector.broadcast %cst_38 : f32 to vector<8x32xf32>
    %58 = arith.maximumf %56, %57 : vector<8x32xf32>
    %cst_39 = arith.constant dense<0.000000e+00> : vector<32xf32>
    %59 = vector.multi_reduction <add>, %58, %cst_39 [0] : vector<8x32xf32> to vector<32xf32>
    %60 = vector.shape_cast %59 : vector<32xf32> to vector<1x32xf32>
    %cst_40 = arith.constant 8.000000e+00 : f32
    %61 = vector.broadcast %cst_40 : f32 to vector<1x32xf32>
    %62 = arith.divf %60, %61 : vector<1x32xf32>
    %63 = arith.truncf %62 : vector<1x32xf32> to vector<1x32xbf16>
    %c0_41 = arith.constant 0 : index
    %c0_42 = arith.constant 0 : index
    %64 = vector.load %arg10[%c0_41, %c0_42] : memref<32x32xbf16, #tpu.memory_space<vmem>>, vector<32x32xbf16>
    %cst_43 = arith.constant dense<0.000000e+00> : vector<1x32xf32>
    %65 = tpu.matmul %63, %64, %cst_43 {dimension_numbers = #tpu.dot_dimension_numbers<[1], [0], [0], [1], [0, 0, 1, 1], [], []>} : vector<1x32xbf16>, vector<32x32xbf16>, vector<1x32xf32> -> vector<1x32xf32>
    %66 = vector.shape_cast %65 : vector<1x32xf32> to vector<1x1x32xf32>
    %c0_44 = arith.constant 0 : index
    %c0_45 = arith.constant 0 : index
    %c0_46 = arith.constant 0 : index
    %67 = vector.load %arg12[%c0_44, %c0_45, %c0_46] : memref<1x1x32xf32, #tpu.memory_space<vmem>>, vector<1x1x32xf32>
    tpu.vector_store %arg12[%c0_44, %c0_45, %c0_46], %66 {strides = array<i32>} : memref<1x1x32xf32, #tpu.memory_space<vmem>>, vector<1x1x32xf32>,
    return
  }
  func.func @transform_0(%arg0: i32) -> (i32, i32, i32) {
    %c0_i32 = arith.constant 0 : i32
    %c0_i32_0 = arith.constant 0 : i32
    %c0_i32_1 = arith.constant 0 : i32
    return %arg0, %c0_i32, %c0_i32_0 : i32, i32, i32
  }
  func.func @transform_1(%arg0: i32) -> (i32, i32) {
    %c0_i32 = arith.constant 0 : i32
    %c0_i32_0 = arith.constant 0 : i32
    %c0_i32_1 = arith.constant 0 : i32
    return %c0_i32, %c0_i32_0 : i32, i32
  }
  func.func @transform_2(%arg0: i32) -> (i32, i32) {
    %c0_i32 = arith.constant 0 : i32
    %c0_i32_0 = arith.constant 0 : i32
    %c0_i32_1 = arith.constant 0 : i32
    return %c0_i32, %c0_i32_0 : i32, i32
  }
  func.func @transform_3(%arg0: i32) -> (i32, i32) {
    %c0_i32 = arith.constant 0 : i32
    %c0_i32_0 = arith.constant 0 : i32
    %c0_i32_1 = arith.constant 0 : i32
    return %c0_i32, %c0_i32_0 : i32, i32
  }
  func.func @transform_4(%arg0: i32) -> (i32, i32) {
    %c0_i32 = arith.constant 0 : i32
    %c0_i32_0 = arith.constant 0 : i32
    %c0_i32_1 = arith.constant 0 : i32
    return %c0_i32, %c0_i32_0 : i32, i32
  }
  func.func @transform_5(%arg0: i32) -> (i32, i32) {
    %c0_i32 = arith.constant 0 : i32
    %c0_i32_0 = arith.constant 0 : i32
    %c0_i32_1 = arith.constant 0 : i32
    return %c0_i32, %c0_i32_0 : i32, i32
  }
  func.func @transform_6(%arg0: i32) -> (i32, i32, i32) {
    %c0_i32 = arith.constant 0 : i32
    %c0_i32_0 = arith.constant 0 : i32
    %c0_i32_1 = arith.constant 0 : i32
    return %arg0, %c0_i32, %c0_i32_0 : i32, i32, i32
  }
  func.func @transform_7(%arg0: i32) -> (i32, i32, i32) {
    %c0_i32 = arith.constant 0 : i32
    %c0_i32_0 = arith.constant 0 : i32
    %c0_i32_1 = arith.constant 0 : i32
    return %arg0, %c0_i32, %c0_i32_0 : i32, i32, i32
  }
  func.func @transform_8(%arg0: i32) -> (i32, i32) {
    %c0_i32 = arith.constant 0 : i32
    %c0_i32_0 = arith.constant 0 : i32
    %c0_i32_1 = arith.constant 0 : i32
    return %c0_i32, %c0_i32_0 : i32, i32
  }
  func.func @transform_9(%arg0: i32) -> (i32, i32) {
    %c0_i32 = arith.constant 0 : i32
    %c0_i32_0 = arith.constant 0 : i32
    %c0_i32_1 = arith.constant 0 : i32
    return %c0_i32, %c0_i32_0 : i32, i32
  }
  func.func @transform_10(%arg0: i32) -> (i32, i32, i32) {
    %c0_i32 = arith.constant 0 : i32
    %c0_i32_0 = arith.constant 0 : i32
    %c0_i32_1 = arith.constant 0 : i32
    return %arg0, %c0_i32, %c0_i32_0 : i32, i32, i32
  }
  func.func @transform_11(%arg0: i32) -> (i32, i32, i32) {
    %c0_i32 = arith.constant 0 : i32
    %c0_i32_0 = arith.constant 0 : i32
    %c0_i32_1 = arith.constant 0 : i32
    return %arg0, %c0_i32, %c0_i32_0 : i32, i32, i32
  }
}

</mosaic_0001>

<bundles_post_ra>
// kernel: tpu_custom_call.1
= control target key start
LH: loop header
LB: loop body
LE: loop exit
PB: predicated region body
PF: predicated region fallthrough
CT: control target
= control target key end

     0   :  { %s2575_s0 = inlined_call_operand.hbm [shape: bf16[2,8,32], index: 0, kind: input, shape index: {}]   ;;  %s2576_s1 = inlined_call_operand.hbm [shape: bf16[32,32], index: 1, kind: input, shape index: {}]   ;;  %s2577_s2 = inlined_call_operand.hbm [shape: bf16[32,32], index: 2, kind: input, shape index: {}]   ;;  %s2578_s3 = inlined_call_operand.hbm [shape: bf16[32,32], index: 3, kind: input, shape index: {}]   ;;  %s2579_s4 = inlined_call_operand.hbm [shape: bf16[32,32], index: 4, kind: input, shape index: {}]   ;;  %s2580_s5 = inlined_call_operand.vmem [shape: bf16[32,32], index: 5, kind: input, shape index: {}]   ;;  %s2581_s6 = inlined_call_operand.hbm [shape: bf16[2,8,16], index: 6, kind: input, shape index: {}]   ;;  %s2582_s7 = inlined_call_operand.hbm [shape: bf16[2,8,8], index: 7, kind: input, shape index: {}]   ;;  %s2583_s8 = inlined_call_operand.hbm [shape: bf16[16,32], index: 8, kind: input, shape index: {}]   ;;  %s2584_s9 = inlined_call_operand.vmem [shape: bf16[32,32], index: 9, kind: input, shape index: {}]   ;;  %s2585_s10 = inlined_call_operand.hbm [shape: f32[2,1,32], index: 10, kind: output, shape index: {0}]   ;;  %s2586_s11 = inlined_call_operand.hbm [shape: f32[2,1,32], index: 11, kind: output, shape index: {1}]  }
   0x1   :  { %2617 = sst [smem:[#allocation33_spill]] %s2576_s1 }
   0x2   :  { %2618 = sst [smem:[#allocation34_spill]] %s2578_s3 }
   0x3   :  { %2619 = sst [smem:[#allocation35_spill]] %s2580_s5 }
   0x4   :  { %2620 = sst [smem:[#allocation36_spill]] %s2581_s6 }
   0x5   :  { %2621 = sst [smem:[#allocation37_spill]] %s2584_s9 }
   0x6   :  { %2622 = sst [smem:[#allocation38_spill]] %s2585_s10 }
   0x7   :  { %2623 = sst [smem:[#allocation39_spill]] %s2586_s11 }
   0x8   :  { %17 = vsyncpa [#allocation3], 0 }
   0x9   :  { %19 = vsyncpa [#allocation3 + $0x1], 0 }
   0xa   :  { %20 = vsyncpa [#allocation6], 0 }
   0xb   :  { %21 = vsyncpa [#allocation9], 0 }
   0xc   :  { %22 = vsyncpa [#allocation12], 0 }
   0xd   :  { %24 = vsyncpa [#allocation12 + $0x1], 0 }
   0xe   :  { %25 = vsyncpa [#allocation15], 0 }
   0xf   :  { %26 = vsyncpa [#allocation4], 0 }
  0x10   :  { %28 = vsyncpa [#allocation4 + $0x1], 0 }
  0x11   :  { %29 = vsyncpa [#allocation18], 0 }
  0x12   :  { %31 = vsyncpa [#allocation18 + $0x1], 0  ;;  %s2078_s17 = smov 0   ;;  %s2080_s18 = smov 0  }
  0x13   :  { %s2082_s19 = smov 0   ;;  %s2084_s20 = smov 0  }
  0x14 LB: > { %2624 = sst [smem:[#allocation26_spill]] %s1990_s17  ;;  %s2004_s21 = smov [#allocation5]   ;;  %s2002_s20 = sphi %s2084_s20, %s2670_s20   ;;  %s1998_s19 = sphi %s2082_s19, %s2674_s19   ;;  %s1994_s18 = sphi %s2080_s18, %s2673_s18   ;;  %s1990_s17 = sphi %s2078_s17, %s2672_s17  }
  0x15   : > { %2625 = sst [smem:[#allocation27_spill]] %s2002_s20  ;;  %s331_s22 = sshll.u32 %s2004_s21, 4  ;;  %s2104_s22 = int_to_ptr.vmem [resolvable:$true] %s331_s22 }
  0x16   : > { %s2099_s23 = sadd.s32 4294967295, %s2002_s20   ;;  %p1372_p0 = scmp.ge.s32.totalorder %s2002_s20, 1 }
  0x17   : > { %2626 = sst [smem:[#allocation28_spill]] %s2099_s23  ;;  %p2600_p1 = scmp.eq.s32.totalorder %s2099_s23, 0 }
  0x18   : > { %p319_p2 = scmp.lt.s32.totalorder %s2002_s20, 3  ;;  %s2005_s25 = smov [#allocation8]  }
  0x19   : > { %s357_s26 = sshll.u32 %s2005_s25, 4  ;;  %s2629_s1 = sld [smem:[#allocation33_spill]]  ;;  %s2119_s26 = int_to_ptr.vmem [resolvable:$true] %s357_s26 }
  0x1a   : > { %p2106_p3 = pnand %p1372_p0, %p319_p2 }
  0x1c   : > { %s2627_s24 = scalar_select %p2106_p3, 1, 0 }
  0x1d   : > { %p1553_p5 = pneg %p2106_p3 }
  0x1f   : > { %p2115_p6 = pnand %p1553_p5, %p2600_p1  ;;  %s1658_s30 = scalar_lea.hbm %s2629_s1, 256 }
  0x20   : > { %p1659_p7 = scmp.ne.s32.totalorder %s2629_s1, %s1658_s30  ;;  %p1665_p11 = scmp.lt.u32.totalorder %s1658_s30, %s2629_s1 }
  0x21   : > { %s2628_s27 = scalar_select %p2115_p6, 1, 0 }
  0x22   : > { %p2129_p8 = pneg %p2115_p6 }
  0x24   : > { %s2630_s14 = scalar_select %p2129_p8, 1, 0 }
  0x25   : > { %p1661_p9 = pnand %p2129_p8, %p1659_p7 }
  0x27   : > { %p1662_p10 = pneg %p1661_p9 }
  0x29   : > { %p1667_p12 = pnand %p1665_p11, %p1662_p10 }
  0x2b   : > { %1670 = shalt.err (!%p1667_p12)
}
  0x2c   : > { %s1671_s21 = scalar_lea.vmem %s2104_s22, 256  ;;  %p1679_p5 = scmp.lt.s32.totalorder %s2104_s22, %s2104_s22 }
  0x2d   : > { %p1672_p13 = scmp.ne.s32.totalorder %s2104_s22, %s1671_s21  ;;  %p1680_p4 = scmp.lt.s32.totalorder %s1671_s21, %s1671_s21 }
  0x2f   : > { %p1674_p0 = pnand %p1672_p13, %p2129_p8  ;;  %p1681_p7 = por %p1680_p4, %p1679_p5 }
  0x31   : > { %p1675_p2 = pneg %p1674_p0 }
  0x33   : > { %p1682_p9 = pnand %p1681_p7, %p1675_p2 }
  0x35   : > { %1685 = shalt.err (!%p1682_p9)
}
  0x36   : > { %s2590_s25 = smov 64   ;;  %s2592_s28 = smov 4  }
  0x37   : > { %1556 = dma.hbm_to_vmem [thread:$0]  (!%p2115_p6), %s2629_s1, 256, %s2104_s22, [#allocation6], %s2590_s25, %s2590_s25, %s2592_s28  }
  0x38   : > { %s2631_s3 = sld [smem:[#allocation34_spill]] }
  0x3e   : > { %s1686_s15 = scalar_lea.hbm %s2631_s3, 256 }
  0x3f   : > { %p1687_p4 = scmp.ne.s32.totalorder %s2631_s3, %s1686_s15  ;;  %p1693_p12 = scmp.lt.u32.totalorder %s1686_s15, %s2631_s3 }
  0x41   : > { %p1689_p10 = pnand %p1687_p4, %p2129_p8 }
  0x43   : > { %p1690_p11 = pneg %p1689_p10 }
  0x45   : > { %p1695_p13 = pnand %p1693_p12, %p1690_p11 }
  0x47   : > { %1698 = shalt.err (!%p1695_p13)
}
  0x48   : > { %s1699_s22 = scalar_lea.vmem %s2119_s26, 256  ;;  %p1707_p7 = scmp.lt.s32.totalorder %s2119_s26, %s2119_s26 }
  0x49   : > { %p1700_p0 = scmp.ne.s32.totalorder %s2119_s26, %s1699_s22  ;;  %p1708_p9 = scmp.lt.s32.totalorder %s1699_s22, %s1699_s22 }
  0x4b   : > { %p1702_p2 = pnand %p1700_p0, %p2129_p8  ;;  %p1709_p4 = por %p1708_p9, %p1707_p7 }
  0x4d   : > { %p1703_p5 = pneg %p1702_p2 }
  0x4f   : > { %p1710_p10 = pnand %p1709_p4, %p1703_p5 }
  0x51   : > { %1713 = shalt.err (!%p1710_p10)
}
  0x52   : > { %1562 = dma.hbm_to_vmem [thread:$0]  (!%p2115_p6), %s2631_s3, 256, %s2119_s26, [#allocation9], %s2590_s25, %s2590_s25, %s2592_s28  }
  0x53   : > { %s1371_s29 = sadd.s32 4294967294, %s2002_s20   ;;  %s2181_s30 = sadd.s32 1, %s2002_s20  }
  0x54   : > { %2632 = sst [smem:[#allocation29_spill]] %s2181_s30  ;;  %s41_s12 = ssub.s32 %s2002_s20, %s2181_s30 }
  0x55   : > { %s44_s13 = sadd.s32 1, %s1998_s19  ;;  %p42_p11 = scmp.eq.s32.totalorder %s41_s12, 0 }
  0x56   : > { %p51_p12 = scmp.ne.s32.totalorder %s1998_s19, %s1994_s18  ;;  %p52_p13 = scmp.eq.s32.totalorder %s2002_s20, 0 }
  0x57   : > { %p57_p0 = scmp.ne.s32.totalorder %s1994_s18, %s1990_s17  ;;  %p280_p7 = scmp.eq.s32.totalorder %s2099_s23, 1 }
  0x58   : > { %s2192_s15 = scalar_select %p42_p11, %s1998_s19, %s44_s13  }
  0x59   : > { %p53_p2 = por %p52_p13, %p51_p12  ;;  %p2196_p5 = por %p2600_p1, %p57_p0 }
  0x5a   : > { %2633 = sst [smem:[#allocation30_spill]] %s2192_s15  ;;  %p286_p9 = scmp.eq.s32.totalorder %s1371_s29, 1 }
  0x5b   : > { %s2634_s16 = scalar_select %p2196_p5, 1, 0 }
  0x5c   : > { %p1591_p4 = scmp.lt.s32.totalorder %s2002_s20, 2  ;;  %s2594_s26 = sand.u32 1, %s1998_s19  }
  0x5d   : > { %p2203_p10 = por %p280_p7, %p51_p12  ;;  %p2207_p3 = por %p286_p9, %p57_p0 }
  0x5e   : > { %s2213_s10 = sshll.u32 %s2594_s26, 2  ;;  %s2216_s11 = sshll.u32 %s2002_s20, 6 }
  0x5f   : > { %s2635_s21 = scalar_select %p2203_p10, 1, 0 }
  0x60   : > { %s2637_s22 = scalar_select %p2207_p3, 1, 0 }
  0x61   : > { %2636 = sst [smem:[#allocation31_spill]] %s2635_s21  ;;  %p2218_p11 = pnand %p1591_p4, %p53_p2 }
  0x62   : > { %2638 = sst [smem:[#allocation32_spill]] %s2637_s22  ;;  %s421_s29 = sand.u32 1, %s2002_s20  }
  0x63   : > { %s2639_s12 = scalar_select %p2218_p11, 1, 0 }
  0x64   : > { %s2640_s6 = sld [smem:[#allocation36_spill]]  ;;  %s425_s26 = scalar_lea.vmem [#allocation11], %s2213_s10 }
  0x65   : > { %s432_s1 = sshll.u32 %s425_s26, 4  ;;  %s2008_s3 = smov [#allocation7]   ;;  %s2230_s1 = int_to_ptr.vmem [resolvable:$true] %s432_s1 }
  0x66   : > { %s2232_s15 = sshll.u32 %s2008_s3, 4  ;;  %s2234_s30 = scalar_lea.sflag [#allocation12], %s421_s29  ;;  %s345_s15 = int_to_ptr.vmem [resolvable:$true] %s2232_s15 }
  0x67   : > { %p2240_p13 = pneg %p2218_p11 }
  0x69   : > { %s2641_s25 = scalar_select %p2240_p13, 1, 0 }
  0x6a   : > { %s2227_s28 = scalar_lea.hbm %s2640_s6, %s2216_s11  ;;  %s1719_s20 = scalar_lea.hbm %s2640_s6, 128 }
  0x6b   : > { %s1714_s22 = scalar_lea.hbm %s2227_s28, 64  ;;  %p1720_p7 = scmp.lt.u32.totalorder %s2227_s28, %s2640_s6 }
  0x6c   : > { %p1715_p12 = scmp.ne.s32.totalorder %s2227_s28, %s1714_s22  ;;  %p1721_p9 = scmp.lt.u32.totalorder %s1719_s20, %s1714_s22 }
  0x6d   : > { %p1723_p1 = scmp.lt.u32.totalorder %s1714_s22, %s2227_s28 }
  0x6e   : > { %p1717_p0 = pnand %p2240_p13, %p1715_p12  ;;  %p1722_p4 = por %p1721_p9, %p1720_p7 }
  0x70   : > { %p1718_p2 = pneg %p1717_p0  ;;  %p1724_p3 = por %p1723_p1, %p1722_p4 }
  0x72   : > { %p1725_p10 = pnand %p1724_p3, %p1718_p2 }
  0x74   : > { %1728 = shalt.err (!%p1725_p10)
}
  0x75   : > { %s1729_s29 = scalar_lea.vmem %s2230_s1, 64  ;;  %s2009_s13 = smov [#allocation11]  }
  0x76   : > { %p1730_p12 = scmp.ne.s32.totalorder %s2230_s1, %s1729_s29  ;;  %s1734_s26 = sshll.u32 %s2009_s13, 4  ;;  %s1735_s26 = int_to_ptr.vmem [resolvable:$false] %s1734_s26 }
  0x77   : > { %s1736_s17 = scalar_lea.vmem %s1735_s26, 128  ;;  %p1737_p6 = scmp.lt.s32.totalorder %s2230_s1, %s1735_s26 }
  0x78   : > { %p1732_p0 = pnand %p1730_p12, %p2240_p13  ;;  %p1738_p8 = scmp.lt.s32.totalorder %s1736_s17, %s1729_s29 }
  0x7a   : > { %p1733_p5 = pneg %p1732_p0  ;;  %p1739_p7 = por %p1738_p8, %p1737_p6 }
  0x7c   : > { %p1740_p9 = pnand %p1739_p7, %p1733_p5 }
  0x7e   : > { %1743 = shalt.err (!%p1740_p9)
}
  0x7f   : > { %1575 = dma.hbm_to_vmem [thread:$0]  (!%p2218_p11), %s2227_s28, 64, %s2230_s1, %s2234_s30  }
  0x80   : > { %s1744_s3 = scalar_lea.hbm %s2577_s2, 256  ;;  %p2642_p3 = scmp.ne.s32.totalorder %s2630_s14, 0 }
  0x81   : > { %p1745_p1 = scmp.ne.s32.totalorder %s2577_s2, %s1744_s3  ;;  %p1751_p5 = scmp.lt.u32.totalorder %s1744_s3, %s2577_s2 }
  0x83   : > { %p1747_p6 = pnand %p1745_p1, %p2642_p3 }
  0x85   : > { %p1748_p8 = pneg %p1747_p6 }
  0x87   : > { %p1753_p10 = pnand %p1751_p5, %p1748_p8 }
  0x89   : > { %1756 = shalt.err (!%p1753_p10)
}
  0x8a   : > { %s1757_s17 = scalar_lea.vmem %s345_s15, 256  ;;  %p1765_p0 = scmp.lt.s32.totalorder %s345_s15, %s345_s15 }
  0x8b   : > { %p1758_p2 = scmp.ne.s32.totalorder %s345_s15, %s1757_s17  ;;  %p1766_p7 = scmp.lt.s32.totalorder %s1757_s17, %s1757_s17 }
  0x8d   : > { %p1760_p4 = pnand %p1758_p2, %p2642_p3  ;;  %p1767_p9 = por %p1766_p7, %p1765_p0 }
  0x8f   : > { %p1761_p12 = pneg %p1760_p4 }
  0x91   : > { %p1768_p11 = pnand %p1767_p9, %p1761_p12 }
  0x93   : > { %1771 = shalt.err (!%p1768_p11)
}
  0x94   : > { %p2643_p1 = scmp.ne.s32.totalorder %s2628_s27, 0  ;;  %s2644_s1 = smov 4  }
  0x95   : > { %s2645_s6 = smov 64   ;;  %s2010_s22 = smov [#allocation10]  }
  0x96   : > { %1559 = dma.hbm_to_vmem [thread:$0]  (!%p2643_p1), %s2577_s2, 256, %s345_s15, [#allocation6], %s2645_s6, %s2645_s6, %s2644_s1  }
  0x97   : > { %s370_s3 = sshll.u32 %s2010_s22, 4  ;;  %s2011_s13 = smov [#allocation14]   ;;  %s371_s3 = int_to_ptr.vmem [resolvable:$true] %s370_s3 }
  0x98   : > { %s386_s29 = sshll.u32 %s2011_s13, 4  ;;  %s1772_s21 = scalar_lea.hbm %s2579_s4, 256  ;;  %s387_s29 = int_to_ptr.vmem [resolvable:$true] %s386_s29 }
  0x99   : > { %p1773_p11 = scmp.ne.s32.totalorder %s2579_s4, %s1772_s21  ;;  %p1779_p5 = scmp.lt.u32.totalorder %s1772_s21, %s2579_s4 }
  0x9b   : > { %p1775_p6 = pnand %p1773_p11, %p2642_p3 }
  0x9d   : > { %p1776_p8 = pneg %p1775_p6 }
  0x9f   : > { %p1781_p10 = pnand %p1779_p5, %p1776_p8 }
  0xa1   : > { %1784 = shalt.err (!%p1781_p10)
}
  0xa2   : > { %s1785_s15 = scalar_lea.vmem %s371_s3, 256  ;;  %p1793_p0 = scmp.lt.s32.totalorder %s371_s3, %s371_s3 }
  0xa3   : > { %p1786_p2 = scmp.ne.s32.totalorder %s371_s3, %s1785_s15  ;;  %p1794_p7 = scmp.lt.s32.totalorder %s1785_s15, %s1785_s15 }
  0xa5   : > { %p1788_p4 = pnand %p1786_p2, %p2642_p3  ;;  %p1795_p9 = por %p1794_p7, %p1793_p0 }
  0xa7   : > { %p1789_p12 = pneg %p1788_p4 }
  0xa9   : > { %p1796_p13 = pnand %p1795_p9, %p1789_p12 }
  0xab   : > { %1799 = shalt.err (!%p1796_p13)
}
  0xac   : > { %1565 = dma.hbm_to_vmem [thread:$0]  (!%p2643_p1), %s2579_s4, 256, %s371_s3, [#allocation9], %s2645_s6, %s2645_s6, %s2644_s1  }
  0xad   : > { %s1800_s20 = scalar_lea.hbm %s2583_s8, 128 }
  0xae   : > { %p1801_p11 = scmp.ne.s32.totalorder %s2583_s8, %s1800_s20  ;;  %p1807_p8 = scmp.lt.u32.totalorder %s1800_s20, %s2583_s8 }
  0xb0   : > { %p1803_p13 = pnand %p1801_p11, %p2642_p3 }
  0xb2   : > { %p1804_p6 = pneg %p1803_p13 }
  0xb4   : > { %p1809_p5 = pnand %p1807_p8, %p1804_p6 }
  0xb6   : > { %1812 = shalt.err (!%p1809_p5)
}
  0xb7   : > { %s1813_s28 = scalar_lea.vmem %s387_s29, 128  ;;  %p1821_p12 = scmp.lt.s32.totalorder %s387_s29, %s387_s29 }
  0xb8   : > { %p1814_p10 = scmp.ne.s32.totalorder %s387_s29, %s1813_s28  ;;  %p1822_p0 = scmp.lt.s32.totalorder %s1813_s28, %s1813_s28 }
  0xba   : > { %p1816_p2 = pnand %p1814_p10, %p2642_p3  ;;  %p1823_p7 = por %p1822_p0, %p1821_p12 }
  0xbc   : > { %p1817_p4 = pneg %p1816_p2 }
  0xbe   : > { %p1824_p9 = pnand %p1823_p7, %p1817_p4 }
  0xc0   : > { %1827 = shalt.err (!%p1824_p9)
}
  0xc1   : > { %1568 = dma.hbm_to_vmem [thread:$0]  (!%p2643_p1), %s2583_s8, 128, %s387_s29, [#allocation15], %s2645_s6, %s2645_s6, %s2644_s1  }
  0xc2   : > { %s2332_s9 = scalar_lea.hbm %s2575_s0, %s2216_s11  ;;  %s407_s27 = scalar_lea.vmem [#allocation2], %s2213_s10 }
  0xc3   : > { %s414_s23 = sshll.u32 %s407_s27, 4  ;;  %s2341_s22 = scalar_lea.hbm %s2582_s7, %s2216_s11  ;;  %s2335_s23 = int_to_ptr.vmem [resolvable:$true] %s414_s23 }
  0xc4   : > { %s2646_s13 = sand.u32 1, %s1998_s19   ;;  %s1828_s6 = scalar_lea.hbm %s2332_s9, 64 }
  0xc5   : > { %s404_s1 = scalar_lea.sflag [#allocation3], %s2646_s13  ;;  %p1829_p3 = scmp.ne.s32.totalorder %s2332_s9, %s1828_s6 }
  0xc6   : > { %p2647_p1 = scmp.ne.s32.totalorder %s2641_s25, 0  ;;  %s1833_s17 = scalar_lea.hbm %s2575_s0, 128 }
  0xc7   : > { %p1834_p6 = scmp.lt.u32.totalorder %s2332_s9, %s2575_s0  ;;  %p1835_p8 = scmp.lt.u32.totalorder %s1833_s17, %s1828_s6 }
  0xc8   : > { %p1831_p11 = pnand %p1829_p3, %p2647_p1  ;;  %p1837_p10 = scmp.lt.u32.totalorder %s1828_s6, %s2332_s9 }
  0xc9   : > { %p1836_p5 = por %p1835_p8, %p1834_p6 }
  0xca   : > { %p1832_p13 = pneg %p1831_p11 }
  0xcb   : > { %p1838_p2 = por %p1837_p10, %p1836_p5 }
  0xcd   : > { %p1839_p4 = pnand %p1838_p2, %p1832_p13 }
  0xcf   : > { %1842 = shalt.err (!%p1839_p4)
}
  0xd0   : > { %s1843_s11 = scalar_lea.vmem %s2335_s23, 64  ;;  %s2012_s15 = smov [#allocation2]  }
  0xd1   : > { %p1844_p12 = scmp.ne.s32.totalorder %s2335_s23, %s1843_s11  ;;  %s1848_s14 = sshll.u32 %s2012_s15, 4  ;;  %s1849_s14 = int_to_ptr.vmem [resolvable:$false] %s1848_s14 }
  0xd2   : > { %s1850_s5 = scalar_lea.vmem %s1849_s14, 128  ;;  %p1851_p9 = scmp.lt.s32.totalorder %s2335_s23, %s1849_s14 }
  0xd3   : > { %p1846_p0 = pnand %p1844_p12, %p2647_p1  ;;  %p1852_p3 = scmp.lt.s32.totalorder %s1850_s5, %s1843_s11 }
  0xd5   : > { %p1847_p7 = pneg %p1846_p0  ;;  %p1853_p11 = por %p1852_p3, %p1851_p9 }
  0xd7   : > { %p1854_p6 = pnand %p1853_p11, %p1847_p7 }
  0xd9   : > { %1857 = shalt.err (!%p1854_p6)
}
  0xda   : > { %p2648_p13 = scmp.ne.s32.totalorder %s2639_s12, 0  ;;  %s443_s27 = scalar_lea.vmem [#allocation13], %s2213_s10 }
  0xdb   : > { %s450_s21 = sshll.u32 %s443_s27, 4  ;;  %s1858_s20 = scalar_lea.hbm %s2341_s22, 64  ;;  %s451_s21 = int_to_ptr.vmem [resolvable:$true] %s450_s21 }
  0xdc   : > { %1572 = dma.hbm_to_vmem [thread:$0]  (!%p2648_p13), %s2332_s9, 64, %s2335_s23, %s404_s1  }
  0xdd   : > { %p1859_p8 = scmp.ne.s32.totalorder %s2341_s22, %s1858_s20  ;;  %s1863_s29 = scalar_lea.hbm %s2582_s7, 128 }
  0xde   : > { %p1864_p2 = scmp.lt.u32.totalorder %s2341_s22, %s2582_s7  ;;  %p1865_p4 = scmp.lt.u32.totalorder %s1863_s29, %s1858_s20 }
  0xdf   : > { %p1861_p5 = pnand %p1859_p8, %p2647_p1  ;;  %p1867_p0 = scmp.lt.u32.totalorder %s1858_s20, %s2341_s22 }
  0xe0   : > { %p1866_p12 = por %p1865_p4, %p1864_p2 }
  0xe1   : > { %p1862_p10 = pneg %p1861_p5 }
  0xe2   : > { %p1868_p7 = por %p1867_p0, %p1866_p12 }
  0xe4   : > { %p1869_p9 = pnand %p1868_p7, %p1862_p10 }
  0xe6   : > { %1872 = shalt.err (!%p1869_p9)
}
  0xe7   : > { %s1873_s10 = scalar_lea.vmem %s451_s21, 64  ;;  %s2013_s9 = smov [#allocation13]  }
  0xe8   : > { %p1874_p3 = scmp.ne.s32.totalorder %s451_s21, %s1873_s10  ;;  %s1878_s23 = sshll.u32 %s2013_s9, 4  ;;  %s1879_s23 = int_to_ptr.vmem [resolvable:$false] %s1878_s23 }
  0xe9   : > { %s1880_s1 = scalar_lea.vmem %s1879_s23, 128  ;;  %p1881_p8 = scmp.lt.s32.totalorder %s451_s21, %s1879_s23 }
  0xea   : > { %p1876_p11 = pnand %p1874_p3, %p2647_p1  ;;  %p1882_p5 = scmp.lt.s32.totalorder %s1880_s1, %s1873_s10 }
  0xec   : > { %p1877_p6 = pneg %p1876_p11  ;;  %p1883_p13 = por %p1882_p5, %p1881_p8 }
  0xee   : > { %p1884_p2 = pnand %p1883_p13, %p1877_p6 }
  0xf0   : > { %1887 = shalt.err (!%p1884_p2)
}
  0xf1   : > { %p2649_p4 = scmp.ne.s32.totalorder %s2639_s12, 0  ;;  %p2650_p10 = scmp.ne.s32.totalorder %s2627_s24, 0 }
  0xf2   : > { %s2388_s25 = sand.u32 (!%p2650_p10), 1, %s1994_s18   ;;  %p2651_p1 = scmp.ne.s32.totalorder (!%p2650_p10), %s2634_s16, 0 }
  0xf3   : > { %1578 = dma.hbm_to_vmem [thread:$0]  (!%p2649_p4), %s2341_s22, 64, %s451_s21, %s2234_s30  }
  0xf4   : > { %459 = sbr.rel (%p2650_p10) target bundleno = 1730 (0x6c2), region = 60  ;;  %s2391_s28 = sshll.u32 (!%p2650_p10), %s2388_s25, 2 }
  0xf5   : > { %s462_s3 = scalar_lea.sflag (!%p2650_p10), [#allocation3], %s2388_s25  ;;  %s465_s11 = scalar_lea.vmem (!%p2650_p10), [#allocation2], %s2391_s28 }
  0xfb   : > { %1961 = dma.done.wait (%p2651_p1), %s462_s3, 64  }
  0xfc   : > { %1963 = vsyncadd (%p2651_p1), %s462_s3, 4294967232  ;;  %s2652_s30 = sld [smem:[#allocation28_spill]] }
 0x102   : > { %p2653_p13 = scmp.eq.s32.totalorder %s2652_s30, 0 }
 0x104   : > { %1965 = dma.done.wait (%p2653_p13), [#allocation6], 512   ;;  %p2654_p12 = pmov %p2653_p13 }
 0x106   : > { %1967 = vsyncadd (%p2654_p12), [#allocation6], 4294966784  ;;  %p2655_p0 = pmov %p2654_p12 }
 0x108   : > { %1969 = dma.done.wait (%p2655_p0), [#allocation9], 512   ;;  %p2656_p7 = pmov %p2655_p0 }
 0x109   : > { %s486_s24 = sand.u32 1, %s2652_s30   ;;  %s490_s22 = scalar_lea.vmem [#allocation11], %s2391_s28 }
 0x10a   : > { %1971 = vsyncadd (%p2656_p7), [#allocation9], 4294966784  ;;  %s487_s12 = scalar_lea.sflag [#allocation12], %s486_s24 }
 0x10b   : > { %1973 = dma.done.wait (%p2651_p1), %s487_s12, 128  }
 0x10c   : > { %1975 = vsyncadd (%p2651_p1), %s487_s12, 4294967168  ;;  %s499_s15 = scalar_lea.vmem [#allocation13], %s2391_s28  ;;  %p2657_p9 = pmov %p2655_p0 }
 0x10d   : > { %p2658_p3 = pmov %p2655_p0 }
 0x10e   : > { %1977 = dma.done.wait (%p2657_p9), [#allocation15], 128  }
 0x10f   : > { %1979 = vsyncadd (%p2658_p3), [#allocation15], 4294967168  ;;  %v2014_v0 = vmov 0.0   ;;  %vm2015_vm0 = vmmov 0   ;;  %v1639_v1 = vld [vmem:[#allocation7] sm:$0xff]   ;;  %v1640_v2 = vld [vmem:[#allocation7 + $0x8] sm:$0xff]  }
 0x110   : > { %1455 = vmatprep.subr.bf16.mxu1 %v2014_v0  ;;  %1447 = vmatprep.subr.bf16.mxu0 %v2014_v0  ;;  %v1641_v3 = vld [vmem:[#allocation5] sm:$0xff]   ;;  %vm573_vm1 = vcmask 261120   ;;  %v1642_v4 = vld [vmem:[#allocation5 + $0x8] sm:$0xff]   ;;  %v2428_v5 = vld [vmem:[%s465_s11] sm:$0xf]  ;;  %vm777_vm2 = vcmask 64512  }
 0x111   : > { %1459 = vmatprep.mubr.msk.bf16.mxu1 %vm2015_vm0, %v2014_v0  ;;  %1451 = vmatprep.mubr.msk.bf16.mxu0 %vm2015_vm0, %v2014_v0  ;;  %v1643_v17 = vld [vmem:[#allocation8] sm:$0xff]   ;;  %v1644_v18 = vld [vmem:[#allocation8 + $0x8] sm:$0xff]   ;;  %vm803_vm3 = vcmask 1043456   ;;  %s2659_s5 = sld [smem:[#allocation35_spill]]  ;;  %v1645_v50 = vld [vmem:[#allocation14] sm:$0xff]   ;;  %vm995_vm4 = vcmask 130048   ;;  %v847_v54 = vunpack.c.l.bf16 %v2428_v5 }
 0x112   : > { %1456 = vmatpush3.bf16.msra.mxu1 %v1639_v1  ;;  %1448 = vmatpush3.bf16.msra.mxu0 %v1641_v3  ;;  %v979_v35 = vld [vmem:[%s499_s15] sm:$0xf]  ;;  %v978_v52 = vld [vmem:[%s490_s22] sm:$0xf]  ;;  %v1648_v63 = vld [vmem:[#allocation10] sm:$0xff]   ;;  %s2660_s6 = sld [smem:[#allocation37_spill]] }
 0x113   : > { %1457 = vmatprep.subr.bf16.mxu1 %v2014_v0  ;;  %1449 = vmatprep.subr.bf16.mxu0 %v2014_v0  ;;  %v980_v37 = vunpack.c.l.bf16 %v979_v35  ;;  %v848_v55 = vsel %vm573_vm1, %v847_v54, 0.0  ;;  %vm976_vm5 = vcmask 253952   ;;  %s548_s17 = scalar_lea.vmem [#allocation16], %s2388_s25  ;;  %s2661_s10 = sld [smem:[#allocation31_spill]] }
 0x114   : > { %v849_v56 = vrot.slane %v848_v55, 4  ;;  %s1417_s9 = sshll.u32 %s2652_s30, 4  ;;  %s1173_s23 = sshll.u32 %s548_s17, 4  ;;  %s1174_s23 = int_to_ptr.vmem [resolvable:$true] %s1173_s23 }
 0x115   : > { %v981_v38 = vsel %vm777_vm2, %v980_v37, 0.0  ;;  %s2662_s3 = sld [smem:[#allocation38_spill]]  ;;  %s1157_s24 = scalar_lea.sflag [#allocation4], %s2388_s25 }
 0x116   : > { %1458 = vmatpush3.bf16.msra.mxu1 %v1640_v2  ;;  %1450 = vmatpush3.bf16.msra.mxu0 %v1642_v4  ;;  %v850_v57 = vadd.f32 %v849_v56, %v848_v55  ;;  %s1888_s12 = scalar_lea.vmem %s1174_s23, 16  ;;  %s2016_s22 = smov [#allocation16]  }
 0x117   : > { %1471 = vmatprep.subr.bf16.mxu1 %v2014_v0  ;;  %1463 = vmatprep.subr.bf16.mxu0 %v2014_v0  ;;  %v1646_v36 = vld [vmem:[%s2659_s5] sm:$0xff]   ;;  %v1647_v53 = vld [vmem:[%s2659_s5 + $0x8] sm:$0xff]   ;;  %p1889_p11 = scmp.ne.s32.totalorder %s1174_s23, %s1888_s12  ;;  %s1892_s15 = sshll.u32 %s2016_s22, 4  ;;  %s1893_s15 = int_to_ptr.vmem [resolvable:$false] %s1892_s15 }
 0x118   : > { %982 = vadd.xlane.f32.xlu1 %v981_v38  ;;  %v851_v58 = vrot.slane %v850_v57, 2  ;;  %s1894_s16 = scalar_lea.vmem %s1893_s15, 32  ;;  %p1895_p2 = scmp.lt.s32.totalorder %s1174_s23, %s1893_s15 }
 0x119   : > { %1460 = vmatmul.mubr.msk.bf16.vlgmr.msra.gmra.mrb[0].mxu1 %vm573_vm1, %v2428_v5  ;;  %1452 = vmatmul.mubr.msk.bf16.vlgmr.msra.gmra.mrb[0].mxu0 %vm573_vm1, %v2428_v5  ;;  %p2663_p6 = scmp.ne.s32.totalorder %s2661_s10, 0  ;;  %p1896_p4 = scmp.lt.s32.totalorder %s1894_s16, %s1888_s12 }
 0x11a   : > { %1473 = vmatprep.mubr.msk.bf16.mxu1 %vm2015_vm0, %v2014_v0  ;;  %1467 = vmatprep.mubr.msk.bf16.mxu0 %vm2015_vm0, %v2014_v0  ;;  %v852_v60 = vadd.f32 %v851_v58, %v850_v57 }
 0x11b   : > { %1464 = vmatpush3.bf16.msra.mxu0 %v1643_v17  ;;  %s2504_s11 = scalar_lea.hbm %s2662_s3, %s1417_s9  ;;  %p1890_p8 = pnand %p1889_p11, %p2663_p6 }
 0x11c   : > { %1465 = vmatprep.subr.bf16.mxu0 %v2014_v0  ;;  %v853_v61 = vrot.slane %v852_v60, 1  ;;  %p1897_p10 = por %p1896_p4, %p1895_p2 }
 0x11d   : > { %p1891_p5 = pneg %p1890_p8 }
 0x11f   : > { %1466 = vmatpush3.bf16.msra.mxu0 %v1644_v18  ;;  %v1650_v18 = vld [vmem:[%s2660_s6] sm:$0xff]   ;;  %p1898_p1 = pnand %p1897_p10, %p1891_p5 }
 0x120   : > { %1477 = vmatprep.subr.bf16.mxu0 %v2014_v0 }
 0x122   : > { %1468 = vmatmul.mubr.msk.bf16.vlgmr.msra.gmra.mrb[4].mxu0 %vm573_vm1, %v2428_v5  ;;  %v1649_v5 = vld [vmem:[#allocation10 + $0x8] sm:$0xff]  }
 0x123   : > { %1479 = vmatprep.mubr.msk.bf16.mxu0 %vm2015_vm0, %v2014_v0 }
 0x1a5   : > { %v983_v59 = vpop.xlane.xlu1 %982 }
 0x1ec   : > { %v667_v6 = vpop.f32.mrb[0].mxu1  ;;  %v611_v10 = vpop.f32.mrb[0].mxu0 }
 0x1ed   : > { %v730_v7 = vpack.c.bf16 %v667_v6, %v667_v6  ;;  %v1461_v8 = vpop.f32.mrb[1].mxu1  ;;  %v1453_v13 = vpop.f32.mrb[1].mxu0  ;;  %v729_v16 = vpack.c.bf16 %v611_v10, %v611_v10  ;;  %v854_v6 = vadd.f32 %v853_v61, %v852_v60 }
 0x1ee   : > { %v670_v9 = vpop.f32.mrb[2].mxu1  ;;  %v614_v14 = vpop.f32.mrb[2].mxu0 }
 0x1ef   : > { %v735_v11 = vsel %vm573_vm1, %v730_v7, 0  ;;  %v1462_v12 = vpop.f32.mrb[3].mxu1  ;;  %v1454_v15 = vpop.f32.mrb[3].mxu0  ;;  %v855_v9 = vmul.f32 0.125, %v854_v6 }
 0x1f0   : > { %1472 = vmatpush3.bf16.xpose.msra.mxu1 %v735_v11 }
 0x1f1   : > { %1483 = vmatprep.subr.bf16.mxu1 %v2014_v0  ;;  %v856_v17 = vpack.c.bf16 %v855_v9, %v855_v9 }
 0x1f5   : > { %v723_v29 = vpop.f32.mrb[4].mxu0 }
 0x1f6   : > { %v799_v30 = vpack.c.bf16 %v723_v29, %v723_v29  ;;  %v1469_v31 = vpop.f32.mrb[5].mxu0 }
 0x1f7   : > { %1474 = vmatmul.mubr.msk.bf16.vlgmr.msra.gmra.mrb[4].mxu1 %vm573_vm1, %v729_v16  ;;  %v726_v32 = vpop.f32.mrb[6].mxu0 }
 0x1f8   : > { %1487 = vmatprep.mubr.msk.bf16.mxu1 %vm2015_vm0, %v2014_v0  ;;  %v805_v33 = vsel %vm803_vm3, %v799_v30, 0  ;;  %v1470_v34 = vpop.f32.mrb[7].mxu0  ;;  %1484 = vmatpush3.bf16.msra.mxu1 %v1646_v36 }
 0x1f9   : > { %1478 = vmatpush3.bf16.msra.mxu0 %v805_v33  ;;  %1485 = vmatprep.subr.bf16.mxu1 %v2014_v0 }
 0x1fa   : > { %1499 = vmatprep.subr.bf16.mxu0 %v2014_v0 }
 0x1fc   : > { %1486 = vmatpush3.bf16.msra.mxu1 %v1647_v53 }
 0x1fd   : > { %1491 = vmatprep.subr.bf16.mxu1 %v2014_v0 }
 0x2ca   : > { %v771_v19 = vpop.f32.mrb[4].mxu1 }
 0x2cb   : > { %v1475_v20 = vpop.f32.mrb[5].mxu1  ;;  %v778_v21 = vsel %vm777_vm2, %v771_v19, -inf }
 0x2cc   : > { %779 = vmax.xlane.f32.xlu0 %v778_v21  ;;  %v774_v22 = vpop.f32.mrb[6].mxu1 }
 0x2cd   : > { %v1476_v23 = vpop.f32.mrb[7].mxu1 }
 0x359   : > { %v780_v24 = vpop.xlane.xlu0 %779 }
 0x35a   : > { %v781_v25 = vsub.f32 %v771_v19, %v780_v24  ;;  %v1651_v19 = vld [vmem:[%s2660_s6 + $0x8] sm:$0xff]  }
 0x35c   : > { %v782_v26 = vmul.f32 1.442695, %v781_v25 }
 0x35e   : > { %1652 = vpow2.f32 %v782_v26 }
 0x368   : > { %v1653_v27 = vpop.eup %1652 }
 0x369   : > { %v784_v28 = vsel %vm777_vm2, %v1653_v27, 0.0 }
 0x36a   : > { %785 = vadd.xlane.f32.xlu0 %v784_v28 }
 0x3f7   : > { %v786_v39 = vpop.xlane.xlu0 %785 }
 0x3f8   : > { %1654 = vrcp.f32 %v786_v39 }
 0x3f9   : > { %1656 = vrcp.f32 %v983_v59 }
 0x402   : > { %v1655_v40 = vpop.eup %1654 }
 0x403   : > { %v788_v41 = vmul.f32 %v1655_v40, %v1653_v27  ;;  %v1657_v7 = vpop.eup %1656 }
 0x404   : > { %v985_v8 = vmul.f32 %v1657_v7, %v980_v37 }
 0x405   : > { %v789_v42 = vsel %vm777_vm2, %v788_v41, 0.0 }
 0x406   : > { %v790_v43 = vrot.slane %v789_v42, 4  ;;  %v986_v14 = vpack.c.bf16 %v985_v8, %v985_v8 }
 0x408   : > { %v791_v44 = vadd.f32 %v790_v43, %v789_v42 }
 0x40a   : > { %v792_v45 = vrot.slane %v791_v44, 2 }
 0x40c   : > { %v793_v46 = vadd.f32 %v792_v45, %v791_v44 }
 0x40e   : > { %v794_v47 = vrot.slane %v793_v46, 1 }
 0x410   : > { %v795_v48 = vadd.f32 %v794_v47, %v793_v46 }
 0x412   : > { %v797_v49 = vmul.f32 0.125, %v795_v48 }
 0x414   : > { %v798_v51 = vpack.c.bf16 %v797_v49, %v797_v49 }
 0x416   : > { %1480 = vmatmul.mubr.msk.bf16.vlgmr.msra.gmra.mrb[8].mxu0 %vm777_vm2, %v798_v51 }
 0x417   : > { %1500 = vmatpush3.bf16.msra.mxu0 %v1645_v50  ;;  %1501 = vmatprep.mubr.msk.bf16.mxu0 %vm2015_vm0, %v2014_v0 }
 0x418   : > { %1505 = vmatprep.subr.bf16.mxu0 %v2014_v0 }
 0x41e   : > { %1502 = vmatmul.mubr.msk.bf16.vlgmr.msra.gmra.mrb[12].mxu0 %vm995_vm4, %v978_v52 }
 0x41f   : > { %1507 = vmatprep.mubr.msk.bf16.mxu0 %vm2015_vm0, %v2014_v0 }
 0x4e9   : > { %v841_v62 = vpop.f32.mrb[8].mxu0 }
 0x4ea   : > { %v861_v1 = vpack.c.bf16 %v841_v62, %v841_v62  ;;  %v1481_v2 = vpop.f32.mrb[9].mxu0 }
 0x4eb   : > { %v844_v3 = vpop.f32.mrb[10].mxu0 }
 0x4ec   : > { %v1482_v4 = vpop.f32.mrb[11].mxu0  ;;  %1488 = vmatmul.mubr.msk.bf16.vlgmr.msra.gmra.mrb[8].mxu1 %vm573_vm1, %v861_v1 }
 0x4ed   : > { %1492 = vmatpush3.bf16.msra.mxu1 %v1648_v63  ;;  %1495 = vmatprep.mubr.msk.bf16.mxu1 %vm2015_vm0, %v2014_v0 }
 0x4ee   : > { %1493 = vmatprep.subr.bf16.mxu1 %v2014_v0 }
 0x4f1   : > { %v1033_v10 = vpop.f32.mrb[12].mxu0  ;;  %1494 = vmatpush3.bf16.msra.mxu1 %v1649_v5 }
 0x4f2   : > { %v1039_v11 = vpack.c.bf16 %v1033_v10, %v1033_v10  ;;  %v1503_v12 = vpop.f32.mrb[13].mxu0  ;;  %1511 = vmatprep.subr.bf16.mxu1 %v2014_v0 }
 0x4f3   : > { %v1036_v13 = vpop.f32.mrb[14].mxu0 }
 0x4f4   : > { %v1044_v15 = vsel %vm803_vm3, %v1039_v11, 0  ;;  %v1504_v16 = vpop.f32.mrb[15].mxu0 }
 0x4f5   : > { %1506 = vmatpush3.bf16.msra.mxu0 %v1044_v15 }
 0x4f8   : > { %1496 = vmatmul.mubr.msk.bf16.vlgmr.msra.gmra.mrb[8].mxu1 %vm573_vm1, %v856_v17  ;;  %1508 = vmatmul.mubr.msk.bf16.vlgmr.msra.gmra.mrb[16].mxu0 %vm777_vm2, %v986_v14 }
 0x4f9   : > { %1515 = vmatprep.mubr.msk.bf16.mxu1 %vm2015_vm0, %v2014_v0  ;;  %1512 = vmatpush3.bf16.msra.mxu1 %v1650_v18 }
 0x4fa   : > { %1513 = vmatprep.subr.bf16.mxu1 %v2014_v0 }
 0x4fd   : > { %1514 = vmatpush3.bf16.msra.mxu1 %v1651_v19 }
 0x5cb   : > { %v970_v20 = vpop.f32.mrb[8].mxu1  ;;  %v1080_v21 = vpop.f32.mrb[16].mxu0 }
 0x5cc   : > { %977 = vst.msk [vmem:[%s548_s17] sm:$0x1] %vm976_vm5, %v970_v20  ;;  %v1086_v22 = vmax.f32 %v1080_v21, 0.0  ;;  %v1497_v23 = vpop.f32.mrb[9].mxu1  ;;  %v1509_v24 = vpop.f32.mrb[17].mxu0 }
 0x5cd   : > { %v973_v25 = vpop.f32.mrb[10].mxu1  ;;  %v1083_v26 = vpop.f32.mrb[18].mxu0 }
 0x5ce   : > { %v1087_v0 = vsel %vm573_vm1, %v1086_v22, 0.0  ;;  %v1498_v27 = vpop.f32.mrb[11].mxu1  ;;  %v1510_v28 = vpop.f32.mrb[19].mxu0 }
 0x5cf   : > { %v1088_v29 = vrot.slane %v1087_v0, 4 }
 0x5d1   : > { %v1089_v30 = vadd.f32 %v1088_v29, %v1087_v0 }
 0x5d3   : > { %v1090_v31 = vrot.slane %v1089_v30, 2 }
 0x5d5   : > { %v1091_v32 = vadd.f32 %v1090_v31, %v1089_v30 }
 0x5d7   : > { %v1092_v33 = vrot.slane %v1091_v32, 1 }
 0x5d9   : > { %v1093_v34 = vadd.f32 %v1092_v33, %v1091_v32 }
 0x5db   : > { %v1094_v35 = vmul.f32 0.125, %v1093_v34 }
 0x5dd   : > { %v1095_v36 = vpack.c.bf16 %v1094_v35, %v1094_v35 }
 0x5df   : > { %1516 = vmatmul.mubr.msk.bf16.vlgmr.msra.gmra.mrb[12].mxu1 %vm573_vm1, %v1095_v36 }
 0x5e0   : > { %1901 = shalt.err (!%p1898_p1)
}
 0x5e1   : > { %s1902_s14 = scalar_lea.hbm %s2504_s11, 16  ;;  %s1906_s20 = scalar_lea.hbm %s2662_s3, 32 }
 0x5e2   : > { %p1903_p13 = scmp.ne.s32.totalorder %s2504_s11, %s1902_s14  ;;  %p1907_p7 = scmp.lt.u32.totalorder %s2504_s11, %s2662_s3 }
 0x5e3   : > { %p1908_p9 = scmp.lt.u32.totalorder %s1906_s20, %s1902_s14  ;;  %p1910_p11 = scmp.lt.u32.totalorder %s1902_s14, %s2504_s11 }
 0x5e4   : > { %p1904_p12 = pnand %p1903_p13, %p2663_p6 }
 0x5e5   : > { %p1909_p3 = por %p1908_p9, %p1907_p7 }
 0x5e6   : > { %p1905_p0 = pneg %p1904_p12 }
 0x5e7   : > { %p1911_p8 = por %p1910_p11, %p1909_p3 }
 0x5e9   : > { %p1912_p5 = pnand %p1911_p8, %p1905_p0 }
 0x5eb   : > { %1915 = shalt.err (!%p1912_p5)
}
 0x5ec   : > { %1549 = dma.vmem_to_hbm [thread:$0]  (%p2663_p6), %s1174_s23, 16, %s2504_s11, %s1157_s24  }
 0x5ed   : > { %s554_s26 = scalar_lea.vmem [#allocation17], %s2388_s25  ;;  %s2664_s12 = sld [smem:[#allocation39_spill]] }
 0x5ee   : > { %s1186_s17 = sshll.u32 %s554_s26, 4  ;;  %s1161_s15 = scalar_lea.sflag [#allocation18], %s2388_s25  ;;  %s2532_s17 = int_to_ptr.vmem [resolvable:$true] %s1186_s17 }
 0x5ef   : > { %s1916_s23 = scalar_lea.vmem %s2532_s17, 16  ;;  %s2017_s30 = smov [#allocation17]  }
 0x5f0   : > { %p1917_p2 = scmp.ne.s32.totalorder %s2532_s17, %s1916_s23  ;;  %s1920_s11 = sshll.u32 %s2017_s30, 4  ;;  %s1921_s11 = int_to_ptr.vmem [resolvable:$false] %s1920_s11 }
 0x5f1   : > { %p1923_p1 = scmp.lt.s32.totalorder %s2532_s17, %s1921_s11 }
 0x5f2   : > { %p1918_p4 = pnand %p1917_p2, %p2663_p6 }
 0x5f3   : > { %s2530_s22 = scalar_lea.hbm %s2664_s12, %s1417_s9  ;;  %s1922_s9 = scalar_lea.vmem %s1921_s11, 32 }
 0x5f4   : > { %p1919_p10 = pneg %p1918_p4  ;;  %p1924_p13 = scmp.lt.s32.totalorder %s1922_s9, %s1916_s23 }
 0x5f6   : > { %p1925_p12 = por %p1924_p13, %p1923_p1 }
 0x5f8   : > { %p1926_p0 = pnand %p1925_p12, %p1919_p10 }
 0x6b2   : > { %v1149_v37 = vpop.f32.mrb[12].mxu1 }
 0x6b3   : > { %1155 = vst.msk [vmem:[%s554_s26] sm:$0x1] %vm976_vm5, %v1149_v37  ;;  %v1517_v38 = vpop.f32.mrb[13].mxu1 }
 0x6b4   : > { %v1152_v39 = vpop.f32.mrb[14].mxu1 }
 0x6b5   : > { %1929 = shalt.err (!%p1926_p0)
}
 0x6b6   : > { %s1930_s25 = scalar_lea.hbm %s2530_s22, 16  ;;  %s1934_s14 = scalar_lea.hbm %s2664_s12, 32 }
 0x6b7   : > { %p1931_p7 = scmp.ne.s32.totalorder %s2530_s22, %s1930_s25  ;;  %p1935_p11 = scmp.lt.u32.totalorder %s2530_s22, %s2664_s12 }
 0x6b8   : > { %p1936_p8 = scmp.lt.u32.totalorder %s1934_s14, %s1930_s25  ;;  %p1938_p2 = scmp.lt.u32.totalorder %s1930_s25, %s2530_s22 }
 0x6b9   : > { %p1932_p9 = pnand %p1931_p7, %p2663_p6 }
 0x6ba   : > { %p1937_p5 = por %p1936_p8, %p1935_p11 }
 0x6bb   : > { %p1933_p3 = pneg %p1932_p9 }
 0x6bc   : > { %p1939_p4 = por %p1938_p2, %p1937_p5 }
 0x6be   : > { %p1940_p10 = pnand %p1939_p4, %p1933_p3 }
 0x6c0   : > { %1943 = shalt.err (!%p1940_p10)
}
 0x6c1   : > { %1550 = dma.vmem_to_hbm [thread:$0]  (%p2663_p6), %s2532_s17, 16, %s2530_s22, %s1161_s15   ;;  %v1518_v40 = vpop.f32.mrb[15].mxu1 }
 0x6c2 PF: > { %s2665_s20 = sld [smem:[#allocation26_spill]]  ;;  %s2666_s13 = sld [smem:[#allocation32_spill]] }
 0x6c3   : > { %s2667_s29 = sld [smem:[#allocation27_spill]] }
 0x6c8   : > { %s1198_s26 = sand.u32 1, %s2665_s20   ;;  %p2668_p1 = scmp.ne.s32.totalorder %s2666_s13, 0 }
 0x6c9   : > { %p2669_p13 = scmp.ge.s32.totalorder %s2667_s29, 2  ;;  %s1199_s1 = scalar_lea.sflag [#allocation4], %s1198_s26 }
 0x6cb   : > { %p1580_p12 = pnand %p2669_p13, %p2668_p1 }
 0x6cd   : > { %1981 = dma.done.wait (!%p1580_p12), %s1199_s1, 16  }
 0x6ce   : > { %1983 = vsyncadd (!%p1580_p12), %s1199_s1, 4294967280  ;;  %s1207_s28 = scalar_lea.sflag [#allocation18], %s1198_s26 }
 0x6cf   : > { %1985 = dma.done.wait (!%p1580_p12), %s1207_s28, 16  }
 0x6d0   : > { %1987 = vsyncadd (!%p1580_p12), %s1207_s28, 4294967280  ;;  %s2670_s20 = sld [smem:[#allocation29_spill]]  ;;  %s2671_s10 = sld [smem:[#allocation30_spill]] }
 0x6d1   : > { %s2672_s17 = smov %s1994_s18  ;;  %s2673_s18 = smov %s1998_s19 }
 0x6d6   : > { %p34_p6 = scmp.ge.s32.totalorder %s2670_s20, 4   ;;  %s2674_s19 = smov %s2671_s10 }
 0x6d8   :  { %36 = sbr.rel (!%p34_p6) target bundleno = 20 (0x14), region = 166 }
 0x6df   :  { %1211 = vsyncpa [#allocation3], 1 }
 0x6e0   :  { %1213 = vsyncpa [#allocation3 + $0x1], 1 }
 0x6e1   :  { %1214 = vsyncpa [#allocation6], 1 }
 0x6e2   :  { %1215 = vsyncpa [#allocation9], 1 }
 0x6e3   :  { %1216 = vsyncpa [#allocation12], 1 }
 0x6e4   :  { %1218 = vsyncpa [#allocation12 + $0x1], 1 }
 0x6e5   :  { %1219 = vsyncpa [#allocation15], 1 }
 0x6e6   :  { %1220 = vsyncpa [#allocation4], 1 }
 0x6e7   :  { %1222 = vsyncpa [#allocation4 + $0x1], 1 }
 0x6e8   :  { %1223 = vsyncpa [#allocation18], 1 }
 0x6e9   :  { %1225 = vsyncpa [#allocation18 + $0x1], 1 }

</bundles_post_ra>
